<compile_context>
chip_gen: v6e
topology: v6e:2x2x1
jax: 0.10.0
libtpu: 0.0.40
codegen_flags: <defaults>
</compile_context>

<pallas_src>
import jax
import jax.numpy as jnp
from jax.experimental import pallas as pl
from jax.experimental.pallas import tpu as pltpu


def _round_up(x, m):
    return (x + m - 1) // m * m


def _sublane_multiple(dtype):
    itemsize = jnp.dtype(dtype).itemsize
    return {4: 8, 2: 16, 1: 32}.get(itemsize, 8)


def prepare_sub_adaptor_params(weight, bias):
    """One-time parameter prep (call at module init, NOT per forward).

    weight: [C, F] (PyTorch nn.Linear layout), bias: [C]
      -> wt: [F, C_pad] pre-transposed, class dim zero-padded to a multiple of
         128 so the MXU result path stays lane-dense (output is NOT padded).
      -> b:  [1, C] in f32 (bias add happens in the f32 accumulator).
    """
    C, F = weight.shape
    C_pad = _round_up(max(C, 128), 128)
    wt = jnp.zeros((F, C_pad), weight.dtype).at[:, :C].set(weight.T)
    b2 = bias.reshape(1, C).astype(jnp.float32)
    return {"wt": wt, "b": b2, "classes": C}


def sub_adaptor_kernel(x_ref, wt_ref, b_ref, o_ref):
    # x: [TB, F], wt: [F, C_pad] (pre-transposed), b: [1, C], o: [TB, C].
    # GRL is identity in forward; linear = x @ wt + b with f32 MXU accumulation.
    acc = jnp.dot(x_ref[...], wt_ref[...], preferred_element_type=jnp.float32)
    c = o_ref.shape[-1]
    o_ref[...] = (acc[:, :c] + b_ref[...]).astype(o_ref.dtype)


def sub_adaptor_forward(embed, params, *, batch_tile=4096, force_pallas=False):
    """embed: [B, F]; params from prepare_sub_adaptor_params -> [B, C]."""
    B, F = embed.shape
    wt, b2, C = params["wt"], params["b"], params["classes"]
    C_pad = wt.shape[1]

    # Small-problem fallback: pallas_call launch + DMA setup cost several us
    # against sub-us of work at the module's native shapes; XLA's fused GEMM
    # is strictly faster there on v5e/v6e/v7x.
    if not force_pallas and B * F < 100_000:
        out = jnp.dot(embed, wt[:, :C], preferred_element_type=jnp.float32) + b2
        return out.astype(embed.dtype)

    # Batch tile: multiple of the dtype's sublane packing, large enough to
    # amortize the ~0.35 us per-grid-step overhead, small enough that the
    # double-buffered footprint stays far under v5e's 16 MiB scoped VMEM.
    mult = _sublane_multiple(embed.dtype)
    TB = min(batch_tile, _round_up(B, mult))
    # v7x megacore: prefer >= 2 independent grid steps so both TCs get work.
    if pl.cdiv(B, TB) < 2 and B > mult:
        TB = max(mult, _round_up(pl.cdiv(B, 2), mult))
    num_tiles = pl.cdiv(B, TB)  # ragged last block -> no padded activation copy

    return pl.pallas_call(
        sub_adaptor_kernel,
        out_shape=jax.ShapeDtypeStruct((B, C), embed.dtype),
        grid=(num_tiles,),
        in_specs=[
            # Activation streamed tile-by-tile (software-pipelined by Pallas).
            pl.BlockSpec((TB, F), lambda i: (i, 0),
                         memory_space=pltpu.MemorySpace.VMEM),
            # Weight / bias: same block every step -> VMEM-resident.
            pl.BlockSpec((F, C_pad), lambda i: (0, 0),
                         memory_space=pltpu.MemorySpace.VMEM),
            pl.BlockSpec((1, C), lambda i: (0, 0),
                         memory_space=pltpu.MemorySpace.VMEM),
        ],
        # Output last dim equals the full array dim (legal even if < 128);
        # masked vst is fine here because the kernel is DMA-bound, and it
        # saves ~8x of output HBM bytes vs. a 128-padded writeback + slice.
        out_specs=pl.BlockSpec((TB, C), lambda i: (i, 0),
                               memory_space=pltpu.MemorySpace.VMEM),
        compiler_params=pltpu.CompilerParams(
            # Batch tiles are independent -> shard across v7x's 2 TensorCores.
            dimension_semantics=("parallel",),
        ),
    )(embed, wt, b2)


if __name__ == "__main__":
    # Small shapes consistent with the module: batch=8, num_feats=32, classes=16
    B, NUM_FEATS, CLASSES = 8, 32, 16

    key = jax.random.PRNGKey(0)
    k_x, k_w, k_b = jax.random.split(key, 3)

    # Deterministic synthetic parameters (nn.Linear-style uniform init bounds)
    bound = 1.0 / (NUM_FEATS ** 0.5)
    embed = jax.random.normal(k_x, (B, NUM_FEATS), dtype=jnp.float32)
    weight = jax.random.uniform(
        k_w, (CLASSES, NUM_FEATS), minval=-bound, maxval=bound, dtype=jnp.float32
    )
    bias = jax.random.uniform(
        k_b, (CLASSES,), minval=-bound, maxval=bound, dtype=jnp.float32
    )

    # One-time parameter prep (module init), reused across forward calls.
    params = prepare_sub_adaptor_params(weight, bias)
    ref_full = lambda x: x @ weight.T + bias

    # 1) Small shape through the Pallas kernel path (forced).
    out = jax.block_until_ready(
        sub_adaptor_forward(embed, params, force_pallas=True)
    )
    assert out.shape == (B, CLASSES)
    assert jnp.allclose(out, ref_full(embed), atol=1e-5, rtol=1e-5)

    # 2) Small shape through the small-problem fallback (default behavior).
    out_fb = jax.block_until_ready(sub_adaptor_forward(embed, params))
    assert jnp.allclose(out_fb, ref_full(embed), atol=1e-5, rtol=1e-5)

    # 3) Multi-tile grid + ragged last block (B=1000, 256-row tiles -> grid=(4,),
    #    last block has 232 valid rows; no padded activation copy, no out slice).
    B2 = 1000
    embed2 = jax.random.normal(jax.random.PRNGKey(1), (B2, NUM_FEATS),
                               dtype=jnp.float32)
    out2 = jax.block_until_ready(
        sub_adaptor_forward(embed2, params, batch_tile=256, force_pallas=True)
    )
    assert out2.shape == (B2, CLASSES)
    assert jnp.allclose(out2, ref_full(embed2), atol=1e-5, rtol=1e-5)

    print("KERNEL_OK")
</pallas_src>

<mosaic_0001>
module attributes {stable_mosaic.version = 11 : i64} {
  func.func @sub_adaptor_kernel(%arg0: i32, %arg1: memref<8x32xf32, #tpu.memory_space<vmem>>, %arg2: memref<32x128xf32, #tpu.memory_space<vmem>>, %arg3: memref<1x16xf32, #tpu.memory_space<vmem>>, %arg4: memref<8x16xf32, #tpu.memory_space<vmem>>) attributes {dimension_semantics = [#tpu.dimension_semantics<parallel>], iteration_bounds = array<i64: 1>, scalar_prefetch = 0 : i64, scratch_operands = 0 : i64, tpu.core_type = #tpu.core_type<tc>, window_params = [{transform_indices = @transform_0, window_bounds = array<i64: 8, 32>}, {pipeline_mode = #tpu.pipeline_mode<synchronous>, transform_indices = @transform_1, window_bounds = array<i64: 32, 128>}, {pipeline_mode = #tpu.pipeline_mode<synchronous>, transform_indices = @transform_2, window_bounds = array<i64: 1, 16>}, {transform_indices = @transform_3, window_bounds = array<i64: 8, 16>}]} {
    %c0 = arith.constant 0 : index
    %c0_0 = arith.constant 0 : index
    %0 = vector.load %arg1[%c0, %c0_0] : memref<8x32xf32, #tpu.memory_space<vmem>>, vector<8x32xf32>
    %c0_1 = arith.constant 0 : index
    %c0_2 = arith.constant 0 : index
    %1 = vector.load %arg2[%c0_1, %c0_2] : memref<32x128xf32, #tpu.memory_space<vmem>>, vector<32x128xf32>
    %cst = arith.constant dense<0.000000e+00> : vector<8x128xf32>
    %2 = tpu.matmul %0, %1, %cst {dimension_numbers = #tpu.dot_dimension_numbers<[1], [0], [0], [1], [0, 0, 1, 1], [], []>} : vector<8x32xf32>, vector<32x128xf32>, vector<8x128xf32> -> vector<8x128xf32>
    %3 = vector.extract_strided_slice %2 {offsets = [0, 0], sizes = [8, 16], strides = [1, 1]} : vector<8x128xf32> to vector<8x16xf32>
    %c0_3 = arith.constant 0 : index
    %c0_4 = arith.constant 0 : index
    %4 = vector.load %arg3[%c0_3, %c0_4] : memref<1x16xf32, #tpu.memory_space<vmem>>, vector<1x16xf32>
    %5 = vector.broadcast %4 : vector<1x16xf32> to vector<8x16xf32>
    %6 = arith.addf %3, %5 : vector<8x16xf32>
    %c0_5 = arith.constant 0 : index
    %c0_6 = arith.constant 0 : index
    %7 = vector.load %arg4[%c0_5, %c0_6] : memref<8x16xf32, #tpu.memory_space<vmem>>, vector<8x16xf32>
    tpu.vector_store %arg4[%c0_5, %c0_6], %6 {strides = array<i32>} : memref<8x16xf32, #tpu.memory_space<vmem>>, vector<8x16xf32>,
    return
  }
  func.func @transform_0(%arg0: i32) -> (i32, i32) {
    %c0_i32 = arith.constant 0 : i32
    %c0_i32_0 = arith.constant 0 : i32
    return %arg0, %c0_i32 : i32, i32
  }
  func.func @transform_1(%arg0: i32) -> (i32, i32) {
    %c0_i32 = arith.constant 0 : i32
    %c0_i32_0 = arith.constant 0 : i32
    %c0_i32_1 = arith.constant 0 : i32
    return %c0_i32, %c0_i32_0 : i32, i32
  }
  func.func @transform_2(%arg0: i32) -> (i32, i32) {
    %c0_i32 = arith.constant 0 : i32
    %c0_i32_0 = arith.constant 0 : i32
    %c0_i32_1 = arith.constant 0 : i32
    return %c0_i32, %c0_i32_0 : i32, i32
  }
  func.func @transform_3(%arg0: i32) -> (i32, i32) {
    %c0_i32 = arith.constant 0 : i32
    %c0_i32_0 = arith.constant 0 : i32
    return %arg0, %c0_i32 : i32, i32
  }
}

</mosaic_0001>

<bundles_post_ra>
// kernel: tpu_custom_call.1
= control target key start
LH: loop header
LB: loop body
LE: loop exit
PB: predicated region body
PF: predicated region fallthrough
CT: control target
= control target key end

     0   :  { %8 = vsyncpa [#allocation3], 0  ;;  %s276_s0 = inlined_call_operand.hbm [shape: f32[8,32], index: 0, kind: input, shape index: {}]   ;;  %s277_s1 = inlined_call_operand.hbm [shape: f32[32,128], index: 1, kind: input, shape index: {}]   ;;  %s278_s2 = inlined_call_operand.vmem [shape: f32[1,16], index: 2, kind: input, shape index: {}]   ;;  %s279_s3 = inlined_call_operand.hbm [shape: f32[8,16], index: 3, kind: output, shape index: {}]  }
   0x1   :  { %9 = vsyncpa [#allocation6], 0 }
   0x2   :  { %10 = vsyncpa [#allocation4], 0  ;;  %s237_s12 = smov [#allocation2]   ;;  %s238_s14 = smov [#allocation5]  }
   0x3   :  { %s17_s13 = sshll.u32 %s237_s12, 4  ;;  %s26_s15 = sshll.u32 %s238_s14, 4  ;;  %s18_s13 = int_to_ptr.vmem [resolvable:$true] %s17_s13  ;;  %s27_s15 = int_to_ptr.vmem [resolvable:$true] %s26_s15 }
   0x4   :  { %s179_s16 = scalar_lea.vmem %s18_s13, 128  ;;  %p184_p1 = scmp.lt.s32.totalorder %s18_s13, %s18_s13 }
   0x5   :  { %p180_p0 = scmp.ne.s32.totalorder %s18_s13, %s179_s16  ;;  %p185_p2 = scmp.lt.s32.totalorder %s179_s16, %s179_s16 }
   0x7   :  { %p186_p3 = por %p185_p2, %p184_p1 }
   0x9   :  { %p187_p4 = pnand %p186_p3, %p180_p0 }
   0xb   :  { %190 = shalt.err (!%p187_p4)
}
   0xc   :  { %20 = dma.hbm_to_vmem [thread:$0]  %s276_s0, 128, %s18_s13, [#allocation3]  }
   0xd   :  { %s199_s19 = scalar_lea.vmem %s27_s15, 512  ;;  %p204_p6 = scmp.lt.s32.totalorder %s27_s15, %s27_s15 }
   0xe   :  { %p200_p5 = scmp.ne.s32.totalorder %s27_s15, %s199_s19  ;;  %p205_p7 = scmp.lt.s32.totalorder %s199_s19, %s199_s19 }
  0x10   :  { %p206_p8 = por %p205_p7, %p204_p6 }
  0x12   :  { %p207_p9 = pnand %p206_p8, %p200_p5 }
  0x14   :  { %210 = shalt.err (!%p207_p9)
}
  0x15   :  { %s239_s20 = smov 128   ;;  %s240_s21 = smov 8  }
  0x16   :  { %32 = dma.hbm_to_vmem [thread:$0]  %s277_s1, 512, %s27_s15, [#allocation6], %s239_s20, %s239_s20, %s240_s21  }
  0x17   :  { %231 = dma.done.wait [#allocation3], 128  }
  0x18   :  { %232 = vsyncadd [#allocation3], 4294967168 }
  0x19   :  { %233 = dma.done.wait [#allocation6], 512  }
  0x1a   :  { %234 = vsyncadd [#allocation6], 4294966784  ;;  %v241_v0 = vmov 0.0   ;;  %vm242_vm0 = vmmov 0   ;;  %v45_v1 = vld [vmem:[#allocation5 + $0x18] sm:$0xff]  ;;  %v44_v2 = vld [vmem:[#allocation5 + $0x10] sm:$0xff] }
  0x1b   :  { %153 = vmatprep.subr.mxu0 %v241_v0  ;;  %161 = vmatprep.mubr.msk.f32.mxu0 %vm242_vm0, %v241_v0  ;;  %v43_v3 = vld [vmem:[#allocation5 + $0x8] sm:$0xff]  ;;  %v42_v4 = vld [vmem:[#allocation5] sm:$0xff]  ;;  %v41_v5 = vld [vmem:[#allocation2] sm:$0xff]  ;;  %vm46_vm1 = vcmask 261120   ;;  %s243_s24 = smov [#allocation7]   ;;  %vm128_vm2 = vcmask 130048  }
  0x1c   :  { %154 = vmatpush3.msra.mxu0 %v45_v1  ;;  %v147_v6 = vld [vmem:[%s278_s2] ss:$0 sm:$0xff]  ;;  %s136_s25 = sshll.u32 %s243_s24, 4  ;;  %s137_s25 = int_to_ptr.vmem [resolvable:$true] %s136_s25 }
  0x1d   :  { %155 = vmatprep.subr.mxu0 %v241_v0  ;;  %s211_s26 = scalar_lea.vmem %s137_s25, 128  ;;  %p216_p11 = scmp.lt.s32.totalorder %s137_s25, %s137_s25 }
  0x1e   :  { %156 = vmatpush3.msra.mxu0 %v44_v2  ;;  %p212_p10 = scmp.ne.s32.totalorder %s137_s25, %s211_s26  ;;  %p217_p12 = scmp.lt.s32.totalorder %s211_s26, %s211_s26 }
  0x1f   :  { %157 = vmatprep.subr.mxu0 %v241_v0 }
  0x20   :  { %158 = vmatpush3.msra.mxu0 %v43_v3  ;;  %p218_p13 = por %p217_p12, %p216_p11 }
  0x21   :  { %159 = vmatprep.subr.mxu0 %v241_v0 }
  0x22   :  { %160 = vmatpush3.msra.mxu0 %v42_v4  ;;  %p219_p0 = pnand %p218_p13, %p212_p10 }
  0x23   :  { %162 = vmatmul.mubr.msk.f32.vlgmr.msra.gmra.mxu0 %vm46_vm1, %v41_v5 }
  0xe3   :  { %v116_v7 = vpop.f32.mrf.mxu0 }
  0xe4   :  { %v127_v8 = vadd.f32 %v147_v6, %v116_v7 }
  0xe5   :  { %v163_v9 = vpop.f32.mrf.mxu0 }
  0xe6   :  { %129 = vst.msk [vmem:[#allocation7] sm:$0xff] %vm128_vm2, %v127_v8 }
  0xe7   :  { %222 = shalt.err (!%p219_p0)
}
  0xe8   :  { %139 = dma.vmem_to_hbm [thread:$0]  %s137_s25, 128, %s279_s3, [#allocation4]  }
  0xe9   :  { %235 = dma.done.wait [#allocation4], 128  }
  0xea   :  { %236 = vsyncadd [#allocation4], 4294967168 }
  0xeb   :  { %143 = vsyncpa [#allocation3], 1 }
  0xec   :  { %144 = vsyncpa [#allocation6], 1 }
  0xed   :  { %145 = vsyncpa [#allocation4], 1 }

</bundles_post_ra>
